<compile_context>
chip_gen: v7x
topology: tpu7x:2x2x1
jax: 0.10.0
libtpu: 0.0.40
codegen_flags: <defaults>
</compile_context>

<pallas_src>
import functools

import jax
import jax.numpy as jnp
from jax.experimental import pallas as pl
from jax.experimental.pallas import tpu as pltpu

LANE = 128        # lane width: last dim of weight/bias/output padded to this
SUBLANE = 8       # f32 sublane multiple for the batch dim
TILE_M_MAX = 256  # M tile once batch grows (fills the 256-wide MXU on v6e/v7x)


def _round_up(n: int, m: int) -> int:
    return ((n + m - 1) // m) * m


def _mlp_kernel(*refs, num_hidden_layers: int):
    """refs = (x, w_in, b_in, [w_hid, b_hid,] w_out, b_out, out).

    Whole layer stack is unrolled in-kernel; the activation never leaves
    VMEM/vregs between layers. bf16 MXU matmuls, f32 accumulate/bias/ReLU.
    """
    if num_hidden_layers > 0:
        x_ref, w_in_ref, b_in_ref, w_hid_ref, b_hid_ref, w_out_ref, b_out_ref, o_ref = refs
    else:
        x_ref, w_in_ref, b_in_ref, w_out_ref, b_out_ref, o_ref = refs
        w_hid_ref = b_hid_ref = None

    # Input layer: Linear + ReLU.
    x16 = x_ref[...].astype(jnp.bfloat16)
    h = jnp.dot(x16, w_in_ref[...], preferred_element_type=jnp.float32)
    h = jnp.maximum(h + b_in_ref[...], 0.0)

    # Hidden layers (statically unrolled): Linear + ReLU.
    for l in range(num_hidden_layers):
        h16 = h.astype(jnp.bfloat16)
        h = jnp.dot(h16, w_hid_ref[l], preferred_element_type=jnp.float32)
        h = jnp.maximum(h + b_hid_ref[l], 0.0)

    # Output layer: Linear (no ReLU).
    h16 = h.astype(jnp.bfloat16)
    out = jnp.dot(h16, w_out_ref[...], preferred_element_type=jnp.float32)
    out = out + b_out_ref[...]
    o_ref[...] = out.astype(o_ref.dtype)


def pack_params(params):
    """One-time weight prep OUTSIDE the forward hot path.

    params: [(W:(in,out) f32, b:(out,) f32), ...] for [input, *hidden, output].
    Pads lane dims to 128 (zero pads are inert through matmul/bias/ReLU), casts
    weights to bf16 (MXU-native, halves HBM bytes), keeps biases f32, and stacks
    the uniform hidden layers into single arrays.
    """
    num_hidden_layers = len(params) - 2
    w_in, b_in = params[0]
    w_out, b_out = params[-1]
    H = w_in.shape[1]
    C = w_out.shape[1]
    H_pad = _round_up(H, LANE)
    C_pad = _round_up(C, LANE)

    packed = {
        "w_in": jnp.pad(w_in, ((0, 0), (0, H_pad - H))).astype(jnp.bfloat16),
        "b_in": jnp.pad(b_in, (0, H_pad - H)).reshape(1, H_pad).astype(jnp.float32),
        "w_out": jnp.pad(w_out, ((0, H_pad - H), (0, C_pad - C))).astype(jnp.bfloat16),
        "b_out": jnp.pad(b_out, (0, C_pad - C)).reshape(1, C_pad).astype(jnp.float32),
    }
    if num_hidden_layers > 0:
        packed["w_hid"] = jnp.stack(
            [jnp.pad(w, ((0, H_pad - H), (0, H_pad - H))) for w, _ in params[1:-1]]
        ).astype(jnp.bfloat16)
        packed["b_hid"] = jnp.stack(
            [jnp.pad(b, (0, H_pad - H)).reshape(1, H_pad) for _, b in params[1:-1]]
        ).astype(jnp.float32)
    return packed


@functools.partial(jax.jit, static_argnames=("num_classes",))
def pallas_mlp(x, packed, *, num_classes):
    """x: (M, K) f32; packed: output of pack_params -> (M, num_classes) f32 logits."""
    M, K = x.shape
    H_pad = packed["w_in"].shape[1]
    C_pad = packed["w_out"].shape[1]
    num_hidden_layers = packed["w_hid"].shape[0] if "w_hid" in packed else 0

    # Row padding + M tiling: grid over M shards across TensorCores on v7x and
    # gives the pipeliner x/out DMA to overlap; weights stay resident (constant
    # index_map). x's K dim is passed UNPADDED (block == full array dim is legal).
    M_pad = _round_up(max(M, SUBLANE), SUBLANE)
    if M_pad > TILE_M_MAX:
        M_pad = _round_up(M_pad, TILE_M_MAX)
        tile_m = TILE_M_MAX
    else:
        tile_m = M_pad
    grid = (M_pad // tile_m,)

    x_p = jnp.pad(x, ((0, M_pad - M), (0, 0))) if M_pad != M else x

    inputs = [x_p, packed["w_in"], packed["b_in"]]
    in_specs = [
        pl.BlockSpec((tile_m, K), lambda i: (i, 0)),
        pl.BlockSpec((K, H_pad), lambda i: (0, 0)),
        pl.BlockSpec((1, H_pad), lambda i: (0, 0)),
    ]
    if num_hidden_layers > 0:
        L = num_hidden_layers
        inputs += [packed["w_hid"], packed["b_hid"]]
        in_specs += [
            pl.BlockSpec((L, H_pad, H_pad), lambda i: (0, 0, 0)),
            pl.BlockSpec((L, 1, H_pad), lambda i: (0, 0, 0)),
        ]
    inputs += [packed["w_out"], packed["b_out"]]
    in_specs += [
        pl.BlockSpec((H_pad, C_pad), lambda i: (0, 0)),
        pl.BlockSpec((1, C_pad), lambda i: (0, 0)),
    ]

    # Explicit VMEM budget: operands (x2 for pipeliner double-buffering) + out tile
    # + f32/bf16 activation temporaries, clamped to a v7x-safe 64 MiB ceiling.
    resident = sum(a.size * a.dtype.itemsize for a in inputs) + tile_m * C_pad * 4
    temps = 3 * tile_m * H_pad * 4
    vmem_limit = int(min(max(2 * resident + temps + (4 << 20), 32 << 20), 64 << 20))
    # TODO(synk): for hidden_dim large enough that stacked weights overflow VMEM
    # (esp. v7x 64 MiB), stream weight tiles via memory_space=pl.ANY + emit_pipeline.

    out_padded = pl.pallas_call(
        functools.partial(_mlp_kernel, num_hidden_layers=num_hidden_layers),
        out_shape=jax.ShapeDtypeStruct((M_pad, C_pad), jnp.float32),
        grid=grid,
        in_specs=in_specs,
        out_specs=pl.BlockSpec((tile_m, C_pad), lambda i: (i, 0)),
        compiler_params=pltpu.CompilerParams(
            dimension_semantics=("parallel",),
            vmem_limit_bytes=vmem_limit,
        ),
    )(*inputs)

    # Slice away padded rows/columns so padded logits can't leak into argmax/loss.
    return out_padded[:M, :num_classes]


def init_mlp_params(key, num_features, hidden_dim, num_hidden_layers, num_classes):
    """Deterministic init mimicking torch.nn.Linear (uniform(-1/sqrt(fan_in), +))."""
    dims = [num_features] + [hidden_dim] * (num_hidden_layers + 1) + [num_classes]
    params = []
    for i in range(len(dims) - 1):
        fan_in, fan_out = dims[i], dims[i + 1]
        key, kw, kb = jax.random.split(key, 3)
        bound = 1.0 / jnp.sqrt(fan_in)
        # stored as (in_features, out_features) == torch weight (out, in) transposed
        w = jax.random.uniform(kw, (fan_in, fan_out), jnp.float32, -bound, bound)
        b = jax.random.uniform(kb, (fan_out,), jnp.float32, -bound, bound)
        params.append((w, b))
    return params


def mlp_forward(x, packed, num_classes):
    """Matches PyTorchMLP.forward: (Linear+ReLU) * (1+num_hidden_layers), final Linear."""
    return pallas_mlp(x, packed, num_classes=num_classes)


if __name__ == "__main__":
    # Small shapes consistent with the module's forward.
    batch = 8
    num_features = 32
    hidden_dim = 32
    num_hidden_layers = 2
    num_classes = 8

    key = jax.random.PRNGKey(0)
    key, kx = jax.random.split(key)
    x = jax.random.normal(kx, (batch, num_features), jnp.float32)

    params = init_mlp_params(key, num_features, hidden_dim,
                             num_hidden_layers, num_classes)
    packed = pack_params(params)           # one-time padding + bf16 cast

    logits = mlp_forward(x, packed, num_classes)
    logits = jax.block_until_ready(logits)

    # Reference with the same numerics (bf16 matmul operands, f32 accumulate,
    # f32 bias/ReLU) — verifies padding/plumbing exactly.
    ref = x
    for i, (w, b) in enumerate(params):
        ref = jnp.dot(ref.astype(jnp.bfloat16), w.astype(jnp.bfloat16),
                      preferred_element_type=jnp.float32) + b
        if i != len(params) - 1:
            ref = jnp.maximum(ref, 0.0)

    # Loose sanity check against the pure-f32 forward (bf16 quantization drift only).
    ref_f32 = x
    for i, (w, b) in enumerate(params):
        ref_f32 = ref_f32 @ w + b
        if i != len(params) - 1:
            ref_f32 = jnp.maximum(ref_f32, 0.0)

    assert logits.shape == (batch, num_classes)
    assert jnp.allclose(logits, ref, atol=1e-4, rtol=1e-4)
    assert jnp.allclose(logits, ref_f32, atol=5e-2, rtol=5e-2)

    print("KERNEL_OK")
</pallas_src>

<mosaic_0001>
module attributes {stable_mosaic.version = 11 : i64} {
  func.func @_mlp_kernel(%arg0: i32, %arg1: memref<8x32xf32, #tpu.memory_space<vmem>>, %arg2: memref<32x128xbf16, #tpu.memory_space<vmem>>, %arg3: memref<1x128xf32, #tpu.memory_space<vmem>>, %arg4: memref<2x128x128xbf16, #tpu.memory_space<vmem>>, %arg5: memref<2x1x128xf32, #tpu.memory_space<vmem>>, %arg6: memref<128x128xbf16, #tpu.memory_space<vmem>>, %arg7: memref<1x128xf32, #tpu.memory_space<vmem>>, %arg8: memref<8x128xf32, #tpu.memory_space<vmem>>) attributes {dimension_semantics = [#tpu.dimension_semantics<parallel>], iteration_bounds = array<i64: 1>, scalar_prefetch = 0 : i64, scratch_operands = 0 : i64, tpu.core_type = #tpu.core_type<tc>, window_params = [{transform_indices = @transform_0, window_bounds = array<i64: 8, 32>}, {pipeline_mode = #tpu.pipeline_mode<synchronous>, transform_indices = @transform_1, window_bounds = array<i64: 32, 128>}, {pipeline_mode = #tpu.pipeline_mode<synchronous>, transform_indices = @transform_2, window_bounds = array<i64: 1, 128>}, {pipeline_mode = #tpu.pipeline_mode<synchronous>, transform_indices = @transform_3, window_bounds = array<i64: 2, 128, 128>}, {pipeline_mode = #tpu.pipeline_mode<synchronous>, transform_indices = @transform_4, window_bounds = array<i64: 2, 1, 128>}, {pipeline_mode = #tpu.pipeline_mode<synchronous>, transform_indices = @transform_5, window_bounds = array<i64: 128, 128>}, {pipeline_mode = #tpu.pipeline_mode<synchronous>, transform_indices = @transform_6, window_bounds = array<i64: 1, 128>}, {transform_indices = @transform_7, window_bounds = array<i64: 8, 128>}]} {
    %c0 = arith.constant 0 : index
    %c0_0 = arith.constant 0 : index
    %0 = vector.load %arg1[%c0, %c0_0] : memref<8x32xf32, #tpu.memory_space<vmem>>, vector<8x32xf32>
    %1 = arith.truncf %0 : vector<8x32xf32> to vector<8x32xbf16>
    %c0_1 = arith.constant 0 : index
    %c0_2 = arith.constant 0 : index
    %2 = vector.load %arg2[%c0_1, %c0_2] : memref<32x128xbf16, #tpu.memory_space<vmem>>, vector<32x128xbf16>
    %cst = arith.constant dense<0.000000e+00> : vector<8x128xf32>
    %3 = tpu.matmul %1, %2, %cst {dimension_numbers = #tpu.dot_dimension_numbers<[1], [0], [0], [1], [0, 0, 1, 1], [], []>} : vector<8x32xbf16>, vector<32x128xbf16>, vector<8x128xf32> -> vector<8x128xf32>
    %c0_3 = arith.constant 0 : index
    %c0_4 = arith.constant 0 : index
    %4 = vector.load %arg3[%c0_3, %c0_4] : memref<1x128xf32, #tpu.memory_space<vmem>>, vector<1x128xf32>
    %5 = vector.broadcast %4 : vector<1x128xf32> to vector<8x128xf32>
    %6 = arith.addf %3, %5 : vector<8x128xf32>
    %cst_5 = arith.constant 0.000000e+00 : f32
    %7 = vector.broadcast %cst_5 : f32 to vector<8x128xf32>
    %8 = arith.maximumf %6, %7 : vector<8x128xf32>
    %9 = arith.truncf %8 : vector<8x128xf32> to vector<8x128xbf16>
    %c0_6 = arith.constant 0 : index
    %c0_7 = arith.constant 0 : index
    %c0_8 = arith.constant 0 : index
    %10 = vector.load %arg4[%c0_6, %c0_7, %c0_8] : memref<2x128x128xbf16, #tpu.memory_space<vmem>>, vector<1x128x128xbf16>
    %11 = vector.shape_cast %10 : vector<1x128x128xbf16> to vector<128x128xbf16>
    %cst_9 = arith.constant dense<0.000000e+00> : vector<8x128xf32>
    %12 = tpu.matmul %9, %11, %cst_9 {dimension_numbers = #tpu.dot_dimension_numbers<[1], [0], [0], [1], [0, 0, 1, 1], [], []>} : vector<8x128xbf16>, vector<128x128xbf16>, vector<8x128xf32> -> vector<8x128xf32>
    %c0_10 = arith.constant 0 : index
    %c0_11 = arith.constant 0 : index
    %c0_12 = arith.constant 0 : index
    %13 = vector.load %arg5[%c0_10, %c0_11, %c0_12] : memref<2x1x128xf32, #tpu.memory_space<vmem>>, vector<1x1x128xf32>
    %14 = vector.shape_cast %13 : vector<1x1x128xf32> to vector<1x128xf32>
    %15 = vector.broadcast %14 : vector<1x128xf32> to vector<8x128xf32>
    %16 = arith.addf %12, %15 : vector<8x128xf32>
    %cst_13 = arith.constant 0.000000e+00 : f32
    %17 = vector.broadcast %cst_13 : f32 to vector<8x128xf32>
    %18 = arith.maximumf %16, %17 : vector<8x128xf32>
    %19 = arith.truncf %18 : vector<8x128xf32> to vector<8x128xbf16>
    %c1 = arith.constant 1 : index
    %c0_14 = arith.constant 0 : index
    %c0_15 = arith.constant 0 : index
    %20 = vector.load %arg4[%c1, %c0_14, %c0_15] : memref<2x128x128xbf16, #tpu.memory_space<vmem>>, vector<1x128x128xbf16>
    %21 = vector.shape_cast %20 : vector<1x128x128xbf16> to vector<128x128xbf16>
    %cst_16 = arith.constant dense<0.000000e+00> : vector<8x128xf32>
    %22 = tpu.matmul %19, %21, %cst_16 {dimension_numbers = #tpu.dot_dimension_numbers<[1], [0], [0], [1], [0, 0, 1, 1], [], []>} : vector<8x128xbf16>, vector<128x128xbf16>, vector<8x128xf32> -> vector<8x128xf32>
    %c1_17 = arith.constant 1 : index
    %c0_18 = arith.constant 0 : index
    %c0_19 = arith.constant 0 : index
    %23 = vector.load %arg5[%c1_17, %c0_18, %c0_19] : memref<2x1x128xf32, #tpu.memory_space<vmem>>, vector<1x1x128xf32>
    %24 = vector.shape_cast %23 : vector<1x1x128xf32> to vector<1x128xf32>
    %25 = vector.broadcast %24 : vector<1x128xf32> to vector<8x128xf32>
    %26 = arith.addf %22, %25 : vector<8x128xf32>
    %cst_20 = arith.constant 0.000000e+00 : f32
    %27 = vector.broadcast %cst_20 : f32 to vector<8x128xf32>
    %28 = arith.maximumf %26, %27 : vector<8x128xf32>
    %29 = arith.truncf %28 : vector<8x128xf32> to vector<8x128xbf16>
    %c0_21 = arith.constant 0 : index
    %c0_22 = arith.constant 0 : index
    %30 = vector.load %arg6[%c0_21, %c0_22] : memref<128x128xbf16, #tpu.memory_space<vmem>>, vector<128x128xbf16>
    %cst_23 = arith.constant dense<0.000000e+00> : vector<8x128xf32>
    %31 = tpu.matmul %29, %30, %cst_23 {dimension_numbers = #tpu.dot_dimension_numbers<[1], [0], [0], [1], [0, 0, 1, 1], [], []>} : vector<8x128xbf16>, vector<128x128xbf16>, vector<8x128xf32> -> vector<8x128xf32>
    %c0_24 = arith.constant 0 : index
    %c0_25 = arith.constant 0 : index
    %32 = vector.load %arg7[%c0_24, %c0_25] : memref<1x128xf32, #tpu.memory_space<vmem>>, vector<1x128xf32>
    %33 = vector.broadcast %32 : vector<1x128xf32> to vector<8x128xf32>
    %34 = arith.addf %31, %33 : vector<8x128xf32>
    %c0_26 = arith.constant 0 : index
    %c0_27 = arith.constant 0 : index
    %35 = vector.load %arg8[%c0_26, %c0_27] : memref<8x128xf32, #tpu.memory_space<vmem>>, vector<8x128xf32>
    tpu.vector_store %arg8[%c0_26, %c0_27], %34 {strides = array<i32>} : memref<8x128xf32, #tpu.memory_space<vmem>>, vector<8x128xf32>,
    return
  }
  func.func @transform_0(%arg0: i32) -> (i32, i32) {
    %c0_i32 = arith.constant 0 : i32
    %c0_i32_0 = arith.constant 0 : i32
    return %arg0, %c0_i32 : i32, i32
  }
  func.func @transform_1(%arg0: i32) -> (i32, i32) {
    %c0_i32 = arith.constant 0 : i32
    %c0_i32_0 = arith.constant 0 : i32
    %c0_i32_1 = arith.constant 0 : i32
    return %c0_i32, %c0_i32_0 : i32, i32
  }
  func.func @transform_2(%arg0: i32) -> (i32, i32) {
    %c0_i32 = arith.constant 0 : i32
    %c0_i32_0 = arith.constant 0 : i32
    %c0_i32_1 = arith.constant 0 : i32
    return %c0_i32, %c0_i32_0 : i32, i32
  }
  func.func @transform_3(%arg0: i32) -> (i32, i32, i32) {
    %c0_i32 = arith.constant 0 : i32
    %c0_i32_0 = arith.constant 0 : i32
    %c0_i32_1 = arith.constant 0 : i32
    %c0_i32_2 = arith.constant 0 : i32
    return %c0_i32, %c0_i32_0, %c0_i32_1 : i32, i32, i32
  }
  func.func @transform_4(%arg0: i32) -> (i32, i32, i32) {
    %c0_i32 = arith.constant 0 : i32
    %c0_i32_0 = arith.constant 0 : i32
    %c0_i32_1 = arith.constant 0 : i32
    %c0_i32_2 = arith.constant 0 : i32
    return %c0_i32, %c0_i32_0, %c0_i32_1 : i32, i32, i32
  }
  func.func @transform_5(%arg0: i32) -> (i32, i32) {
    %c0_i32 = arith.constant 0 : i32
    %c0_i32_0 = arith.constant 0 : i32
    %c0_i32_1 = arith.constant 0 : i32
    return %c0_i32, %c0_i32_0 : i32, i32
  }
  func.func @transform_6(%arg0: i32) -> (i32, i32) {
    %c0_i32 = arith.constant 0 : i32
    %c0_i32_0 = arith.constant 0 : i32
    %c0_i32_1 = arith.constant 0 : i32
    return %c0_i32, %c0_i32_0 : i32, i32
  }
  func.func @transform_7(%arg0: i32) -> (i32, i32) {
    %c0_i32 = arith.constant 0 : i32
    %c0_i32_0 = arith.constant 0 : i32
    return %arg0, %c0_i32 : i32, i32
  }
}

</mosaic_0001>

<bundles_post_ra>
// kernel: pallas_mlp.1
= control target key start
LH: loop header
LB: loop body
LE: loop exit
PB: predicated region body
PF: predicated region fallthrough
CT: control target
= control target key end

     0   :  { %12 = vsyncpa [#allocation3], 0  ;;  %s998_s0 = inlined_call_operand.hbm [shape: f32[8,32], index: 0, kind: input, shape index: {}]   ;;  %s999_s1 = inlined_call_operand.vmem [shape: bf16[32,128], index: 1, kind: input, shape index: {}]   ;;  %s1000_s2 = inlined_call_operand.hbm [shape: f32[1,128], index: 2, kind: input, shape index: {}]   ;;  %s1001_s3 = inlined_call_operand.hbm [shape: bf16[2,128,128], index: 3, kind: input, shape index: {}]   ;;  %s1002_s4 = inlined_call_operand.vmem [shape: f32[2,1,128], index: 4, kind: input, shape index: {}]   ;;  %s1003_s5 = inlined_call_operand.hbm [shape: bf16[128,128], index: 5, kind: input, shape index: {}]   ;;  %s1004_s6 = inlined_call_operand.hbm [shape: f32[1,128], index: 6, kind: input, shape index: {}]   ;;  %s1005_s7 = inlined_call_operand.hbm [shape: f32[8,128], index: 7, kind: output, shape index: {}]  }
   0x1   :  { %13 = vsyncpa [#allocation6], 0 }
   0x2   :  { %14 = vsyncpa [#allocation9], 0 }
   0x3   :  { %15 = vsyncpa [#allocation4], 0  ;;  %s824_s24 = smov [#allocation5]   ;;  %s684_s28 = scalar_lea.hbm %s1000_s2, 16 }
   0x4   :  { %s34_s25 = sshll.u32 %s824_s24, 4  ;;  %p685_p0 = scmp.ne.s32.totalorder %s1000_s2, %s684_s28  ;;  %s35_s25 = int_to_ptr.vmem [resolvable:$true] %s34_s25 }
   0x5   :  { %p688_p1 = scmp.lt.u32.totalorder %s684_s28, %s1000_s2 }
   0x7   :  { %p690_p2 = pnand %p688_p1, %p685_p0 }
   0x9   :  { %693 = shalt.err (!%p690_p2)
}
   0xa   :  { %s694_s10 = scalar_lea.vmem %s35_s25, 16  ;;  %s698_s11 = scalar_lea.vmem %s35_s25, 32 }
   0xb   :  { %p695_p3 = scmp.ne.s32.totalorder %s35_s25, %s694_s10  ;;  %p699_p4 = scmp.lt.s32.totalorder %s35_s25, %s35_s25 }
   0xc   :  { %p700_p5 = scmp.lt.s32.totalorder %s698_s11, %s694_s10 }
   0xe   :  { %p701_p6 = por %p700_p5, %p699_p4 }
  0x10   :  { %p702_p7 = pnand %p701_p6, %p695_p3 }
  0x12   :  { %705 = shalt.err (!%p702_p7)
}
  0x13   :  { %37 = dma.hbm_to_vmem [thread:$0]  %s1000_s2, 16, %s35_s25, [#allocation6]  }
  0x14   :  { %s825_s14 = smov [#allocation8]   ;;  %s826_s16 = smov [#allocation2]  }
  0x15   :  { %s57_s15 = sshll.u32 %s825_s14, 4  ;;  %s22_s17 = sshll.u32 %s826_s16, 4  ;;  %s58_s15 = int_to_ptr.vmem [resolvable:$true] %s57_s15  ;;  %s23_s17 = int_to_ptr.vmem [resolvable:$true] %s22_s17 }
  0x16   :  { %s706_s20 = scalar_lea.hbm %s1003_s5, 1024 }
  0x17   :  { %p707_p8 = scmp.ne.s32.totalorder %s1003_s5, %s706_s20  ;;  %p710_p9 = scmp.lt.u32.totalorder %s706_s20, %s1003_s5 }
  0x19   :  { %p712_p10 = pnand %p710_p9, %p707_p8 }
  0x1b   :  { %715 = shalt.err (!%p712_p10)
}
  0x1c   :  { %s716_s2 = scalar_lea.vmem %s58_s15, 1024  ;;  %p721_p12 = scmp.lt.s32.totalorder %s58_s15, %s58_s15 }
  0x1d   :  { %p717_p11 = scmp.ne.s32.totalorder %s58_s15, %s716_s2  ;;  %p722_p13 = scmp.lt.s32.totalorder %s716_s2, %s716_s2 }
  0x1f   :  { %p723_p0 = por %p722_p13, %p721_p12 }
  0x21   :  { %p724_p1 = pnand %p723_p0, %p717_p11 }
  0x23   :  { %727 = shalt.err (!%p724_p1)
}
  0x24   :  { %s827_s25 = smov 64   ;;  %s828_s26 = smov 4  }
  0x25   :  { %63 = dma.hbm_to_vmem [thread:$0]  %s1003_s5, 1024, %s58_s15, [#allocation9], %s827_s25, %s827_s25, %s828_s26  }
  0x26   :  { %s728_s8 = scalar_lea.hbm %s998_s0, 128 }
  0x27   :  { %p729_p2 = scmp.ne.s32.totalorder %s998_s0, %s728_s8  ;;  %p732_p3 = scmp.lt.u32.totalorder %s728_s8, %s998_s0 }
  0x29   :  { %p734_p4 = pnand %p732_p3, %p729_p2 }
  0x2b   :  { %737 = shalt.err (!%p734_p4)
}
  0x2c   :  { %s738_s13 = scalar_lea.vmem %s23_s17, 128  ;;  %p743_p6 = scmp.lt.s32.totalorder %s23_s17, %s23_s17 }
  0x2d   :  { %p739_p5 = scmp.ne.s32.totalorder %s23_s17, %s738_s13  ;;  %p744_p7 = scmp.lt.s32.totalorder %s738_s13, %s738_s13 }
  0x2f   :  { %p745_p8 = por %p744_p7, %p743_p6 }
  0x31   :  { %p746_p9 = pnand %p745_p8, %p739_p5 }
  0x33   :  { %749 = shalt.err (!%p746_p9)
}
  0x34   :  { %25 = dma.hbm_to_vmem [thread:$0]  %s998_s0, 128, %s23_s17, [#allocation3]  }
  0x35   :  { %s829_s15 = smov [#allocation7]   ;;  %s830_s18 = smov [#allocation10]  }
  0x36   :  { %s43_s16 = sshll.u32 %s829_s15, 4  ;;  %s70_s19 = sshll.u32 %s830_s18, 4  ;;  %s44_s16 = int_to_ptr.vmem [resolvable:$true] %s43_s16  ;;  %s71_s19 = int_to_ptr.vmem [resolvable:$true] %s70_s19 }
  0x37   :  { %s750_s22 = scalar_lea.hbm %s1001_s3, 2048 }
  0x38   :  { %p751_p10 = scmp.ne.s32.totalorder %s1001_s3, %s750_s22  ;;  %p754_p11 = scmp.lt.u32.totalorder %s750_s22, %s1001_s3 }
  0x3a   :  { %p756_p12 = pnand %p754_p11, %p751_p10 }
  0x3c   :  { %759 = shalt.err (!%p756_p12)
}
  0x3d   :  { %s760_s0 = scalar_lea.vmem %s44_s16, 2048  ;;  %p765_p0 = scmp.lt.s32.totalorder %s44_s16, %s44_s16 }
  0x3e   :  { %p761_p13 = scmp.ne.s32.totalorder %s44_s16, %s760_s0  ;;  %p766_p1 = scmp.lt.s32.totalorder %s760_s0, %s760_s0 }
  0x40   :  { %p767_p2 = por %p766_p1, %p765_p0 }
  0x42   :  { %p768_p3 = pnand %p767_p2, %p761_p13 }
  0x44   :  { %771 = shalt.err (!%p768_p3)
}
  0x45   :  { %49 = dma.hbm_to_vmem [thread:$0]  %s1001_s3, 2048, %s44_s16, [#allocation6], %s827_s25, %s827_s25, %s828_s26  }
  0x46   :  { %s772_s8 = scalar_lea.hbm %s1004_s6, 16 }
  0x47   :  { %p773_p4 = scmp.ne.s32.totalorder %s1004_s6, %s772_s8  ;;  %p776_p5 = scmp.lt.u32.totalorder %s772_s8, %s1004_s6 }
  0x49   :  { %p778_p6 = pnand %p776_p5, %p773_p4 }
  0x4b   :  { %781 = shalt.err (!%p778_p6)
}
  0x4c   :  { %s782_s13 = scalar_lea.vmem %s71_s19, 16  ;;  %s786_s5 = scalar_lea.vmem %s71_s19, 32 }
  0x4d   :  { %p783_p7 = scmp.ne.s32.totalorder %s71_s19, %s782_s13  ;;  %p787_p8 = scmp.lt.s32.totalorder %s71_s19, %s71_s19 }
  0x4e   :  { %p788_p9 = scmp.lt.s32.totalorder %s786_s5, %s782_s13 }
  0x50   :  { %p789_p10 = por %p788_p9, %p787_p8 }
  0x52   :  { %p790_p11 = pnand %p789_p10, %p783_p7 }
  0x54   :  { %793 = shalt.err (!%p790_p11)
}
  0x55   :  { %73 = dma.hbm_to_vmem [thread:$0]  %s1004_s6, 16, %s71_s19, [#allocation9]  }
  0x56   :  { %816 = dma.done.wait [#allocation3], 128  }
  0x57   :  { %817 = vsyncadd [#allocation3], 4294967168 }
  0x58   :  { %818 = dma.done.wait [#allocation6], 2064  }
  0x59   :  { %819 = vsyncadd [#allocation6], 4294965232 }
  0x5a   :  { %820 = dma.done.wait [#allocation9], 1040  }
  0x5b   :  { %821 = vsyncadd [#allocation9], 4294966256  ;;  %v831_v0 = vmov 0.0   ;;  %vm832_vm0 = vmmov 0   ;;  %v658_v1 = vld [vmem:[%s999_s1] sm:$0xff]   ;;  %v659_v2 = vld [vmem:[%s999_s1 + $0x8] sm:$0xff]  }
  0x5c   :  { %580 = vmatprep.subr.bf16.mxu0 %v831_v0  ;;  %584 = vmatprep.mubr.msk.bf16.mxu0 %vm832_vm0, %v831_v0  ;;  %v90_v3 = vld [vmem:[#allocation2] sm:$0xff]  ;;  %v660_v4 = vld [vmem:[#allocation7] sm:$0xff]   ;;  %v661_v6 = vld [vmem:[#allocation7 + $0x8] sm:$0xff]   ;;  %vm115_vm1 = vcmask 261120   ;;  %s833_s20 = smov [#allocation11]  }
  0x5d   :  { %588 = vmatprep.subr.bf16.mxu1 %v831_v0  ;;  %604 = vmatprep.mubr.msk.bf16.mxu1 %vm832_vm0, %v831_v0  ;;  %v91_v5 = vpack.c.bf16 %v90_v3, %v90_v3  ;;  %v662_v7 = vld [vmem:[#allocation7 + $0x10] sm:$0xff]   ;;  %v663_v8 = vld [vmem:[#allocation7 + $0x18] sm:$0xff]   ;;  %v664_v9 = vld [vmem:[#allocation7 + $0x20] sm:$0xff]   ;;  %s507_s21 = sshll.u32 %s833_s20, 4  ;;  %s508_s21 = int_to_ptr.vmem [resolvable:$true] %s507_s21 }
  0x5e   :  { %581 = vmatpush3.bf16.msra.mxu0 %v658_v1  ;;  %589 = vmatpush3.bf16.msra.mxu1 %v660_v4  ;;  %v665_v10 = vld [vmem:[#allocation7 + $0x28] sm:$0xff]   ;;  %v666_v11 = vld [vmem:[#allocation7 + $0x30] sm:$0xff]   ;;  %v667_v12 = vld [vmem:[#allocation7 + $0x38] sm:$0xff]   ;;  %s794_s22 = scalar_lea.vmem %s508_s21, 128  ;;  %p799_p13 = scmp.lt.s32.totalorder %s508_s21, %s508_s21 }
  0x5f   :  { %582 = vmatprep.subr.bf16.mxu0 %v831_v0  ;;  %590 = vmatprep.subr.bf16.mxu1 %v831_v0  ;;  %v668_v13 = vld [vmem:[#allocation7 + $0x40] sm:$0xff]   ;;  %v669_v14 = vld [vmem:[#allocation7 + $0x48] sm:$0xff]   ;;  %v670_v15 = vld [vmem:[#allocation7 + $0x50] sm:$0xff]   ;;  %p795_p12 = scmp.ne.s32.totalorder %s508_s21, %s794_s22  ;;  %p800_p0 = scmp.lt.s32.totalorder %s794_s22, %s794_s22 }
  0x60   :  { %v671_v16 = vld [vmem:[#allocation7 + $0x58] sm:$0xff]   ;;  %v672_v17 = vld [vmem:[#allocation7 + $0x60] sm:$0xff]   ;;  %v673_v18 = vld [vmem:[#allocation7 + $0x68] sm:$0xff]  }
  0x61   :  { %v518_v19 = vld [vmem:[#allocation5] ss:$0 sm:$0xff]  ;;  %v674_v27 = vld [vmem:[#allocation7 + $0x70] sm:$0xff]   ;;  %v676_v29 = vld [vmem:[#allocation8] sm:$0xff]   ;;  %p801_p1 = por %p800_p0, %p799_p13 }
  0x62   :  { %583 = vmatpush3.bf16.msra.mxu0 %v659_v2  ;;  %591 = vmatpush3.bf16.msra.mxu1 %v661_v6  ;;  %v675_v28 = vld [vmem:[#allocation7 + $0x78] sm:$0xff]   ;;  %v677_v30 = vld [vmem:[#allocation8 + $0x8] sm:$0xff]   ;;  %v678_v31 = vld [vmem:[#allocation8 + $0x10] sm:$0xff]  }
  0x63   :  { %608 = vmatprep.subr.bf16.mxu0 %v831_v0  ;;  %592 = vmatprep.subr.bf16.mxu1 %v831_v0  ;;  %v679_v32 = vld [vmem:[#allocation8 + $0x18] sm:$0xff]   ;;  %v680_v33 = vld [vmem:[#allocation8 + $0x20] sm:$0xff]   ;;  %v681_v34 = vld [vmem:[#allocation8 + $0x28] sm:$0xff]   ;;  %p802_p2 = pnand %p801_p1, %p795_p12 }
  0x64   :  { %v522_v35 = vld [vmem:[%s1002_s4] ss:$0 sm:$0xff]  ;;  %v682_v43 = vld [vmem:[#allocation8 + $0x30] sm:$0xff]   ;;  %v683_v44 = vld [vmem:[#allocation8 + $0x38] sm:$0xff]  }
  0x65   :  { %585 = vmatmul.mubr.msk.bf16.vlgmr.msra.gmra.mrb[0].mxu0 %vm115_vm1, %v91_v5  ;;  %v532_v45 = vld [vmem:[%s1002_s4 + $0x1] ss:$0 sm:$0xff]  ;;  %v541_v53 = vld [vmem:[#allocation10] ss:$0 sm:$0xff] }
  0x66   :  { %624 = vmatprep.mubr.msk.bf16.mxu0 %vm832_vm0, %v831_v0  ;;  %593 = vmatpush3.bf16.msra.mxu1 %v662_v7 }
  0x67   :  { %594 = vmatprep.subr.bf16.mxu1 %v831_v0  ;;  %609 = vmatpush3.bf16.msra.mxu0 %v668_v13 }
  0x68   :  { %610 = vmatprep.subr.bf16.mxu0 %v831_v0 }
  0x6a   :  { %595 = vmatpush3.bf16.msra.mxu1 %v663_v8 }
  0x6b   :  { %596 = vmatprep.subr.bf16.mxu1 %v831_v0  ;;  %611 = vmatpush3.bf16.msra.mxu0 %v669_v14 }
  0x6c   :  { %612 = vmatprep.subr.bf16.mxu0 %v831_v0 }
  0x6e   :  { %597 = vmatpush3.bf16.msra.mxu1 %v664_v9 }
  0x6f   :  { %598 = vmatprep.subr.bf16.mxu1 %v831_v0  ;;  %613 = vmatpush3.bf16.msra.mxu0 %v670_v15 }
  0x70   :  { %614 = vmatprep.subr.bf16.mxu0 %v831_v0 }
  0x72   :  { %599 = vmatpush3.bf16.msra.mxu1 %v665_v10 }
  0x73   :  { %600 = vmatprep.subr.bf16.mxu1 %v831_v0  ;;  %615 = vmatpush3.bf16.msra.mxu0 %v671_v16 }
  0x74   :  { %616 = vmatprep.subr.bf16.mxu0 %v831_v0 }
  0x76   :  { %601 = vmatpush3.bf16.msra.mxu1 %v666_v11 }
  0x77   :  { %602 = vmatprep.subr.bf16.mxu1 %v831_v0  ;;  %617 = vmatpush3.bf16.msra.mxu0 %v672_v17 }
  0x78   :  { %618 = vmatprep.subr.bf16.mxu0 %v831_v0 }
  0x7a   :  { %603 = vmatpush3.bf16.msra.mxu1 %v667_v12 }
  0x7b   :  { %628 = vmatprep.subr.bf16.mxu1 %v831_v0  ;;  %619 = vmatpush3.bf16.msra.mxu0 %v673_v18 }
  0x7c   :  { %620 = vmatprep.subr.bf16.mxu0 %v831_v0 }
  0x7f   :  { %621 = vmatpush3.bf16.msra.mxu0 %v674_v27 }
  0x80   :  { %622 = vmatprep.subr.bf16.mxu0 %v831_v0 }
  0x83   :  { %623 = vmatpush3.bf16.msra.mxu0 %v675_v28 }
 0x138   :  { %v153_v20 = vpop.f32.mrb[0].mxu0 }
 0x139   :  { %v154_v21 = vadd.f32 %v518_v19, %v153_v20  ;;  %v586_v22 = vpop.f32.mrb[1].mxu0 }
 0x13a   :  { %v156_v23 = vpop.f32.mrb[2].mxu0 }
 0x13b   :  { %v159_v24 = vmax.f32 %v154_v21, 0.0  ;;  %v587_v25 = vpop.f32.mrb[3].mxu0 }
 0x13d   :  { %v160_v26 = vpack.c.bf16 %v159_v24, %v159_v24 }
 0x13f   :  { %605 = vmatmul.mubr.bf16.vlgmr.msra.gmra.mrb[0].mxu1 %v160_v26 }
 0x140   :  { %644 = vmatprep.mubr.msk.bf16.mxu1 %vm832_vm0, %v831_v0  ;;  %629 = vmatpush3.bf16.msra.mxu1 %v676_v29 }
 0x141   :  { %630 = vmatprep.subr.bf16.mxu1 %v831_v0 }
 0x144   :  { %631 = vmatpush3.bf16.msra.mxu1 %v677_v30 }
 0x145   :  { %632 = vmatprep.subr.bf16.mxu1 %v831_v0 }
 0x148   :  { %633 = vmatpush3.bf16.msra.mxu1 %v678_v31 }
 0x149   :  { %634 = vmatprep.subr.bf16.mxu1 %v831_v0 }
 0x14c   :  { %635 = vmatpush3.bf16.msra.mxu1 %v679_v32 }
 0x14d   :  { %636 = vmatprep.subr.bf16.mxu1 %v831_v0 }
 0x150   :  { %637 = vmatpush3.bf16.msra.mxu1 %v680_v33 }
 0x151   :  { %638 = vmatprep.subr.bf16.mxu1 %v831_v0 }
 0x154   :  { %639 = vmatpush3.bf16.msra.mxu1 %v681_v34 }
 0x155   :  { %640 = vmatprep.subr.bf16.mxu1 %v831_v0 }
 0x158   :  { %641 = vmatpush3.bf16.msra.mxu1 %v682_v43 }
 0x159   :  { %642 = vmatprep.subr.bf16.mxu1 %v831_v0 }
 0x15c   :  { %643 = vmatpush3.bf16.msra.mxu1 %v683_v44 }
 0x212   :  { %v266_v36 = vpop.f32.mrb[0].mxu1 }
 0x213   :  { %v267_v37 = vadd.f32 %v522_v35, %v266_v36  ;;  %v606_v38 = vpop.f32.mrb[1].mxu1 }
 0x214   :  { %v269_v39 = vpop.f32.mrb[2].mxu1 }
 0x215   :  { %v272_v40 = vmax.f32 %v267_v37, 0.0  ;;  %v607_v41 = vpop.f32.mrb[3].mxu1 }
 0x217   :  { %v273_v42 = vpack.c.bf16 %v272_v40, %v272_v40 }
 0x219   :  { %625 = vmatmul.mubr.bf16.vlgmr.msra.gmra.mrb[4].mxu0 %v273_v42 }
 0x2ec   :  { %v381_v46 = vpop.f32.mrb[4].mxu0 }
 0x2ed   :  { %v382_v47 = vadd.f32 %v532_v45, %v381_v46  ;;  %v626_v48 = vpop.f32.mrb[5].mxu0 }
 0x2ee   :  { %v384_v49 = vpop.f32.mrb[6].mxu0 }
 0x2ef   :  { %v387_v50 = vmax.f32 %v382_v47, 0.0  ;;  %v627_v51 = vpop.f32.mrb[7].mxu0 }
 0x2f1   :  { %v388_v52 = vpack.c.bf16 %v387_v50, %v387_v50 }
 0x2f3   :  { %645 = vmatmul.mubr.bf16.vlgmr.msra.gmra.mrb[4].mxu1 %v388_v52 }
 0x3c6   :  { %v494_v54 = vpop.f32.mrb[4].mxu1 }
 0x3c7   :  { %v495_v55 = vadd.f32 %v541_v53, %v494_v54  ;;  %v646_v56 = vpop.f32.mrb[5].mxu1 }
 0x3c8   :  { %v497_v57 = vpop.f32.mrb[6].mxu1 }
 0x3c9   :  { %500 = vst [vmem:[#allocation11] sm:$0xff] %v495_v55  ;;  %v647_v58 = vpop.f32.mrb[7].mxu1 }
 0x3ca   :  { %805 = shalt.err (!%p802_p2)
}
 0x3cb   :  { %s806_s24 = scalar_lea.hbm %s1005_s7, 128 }
 0x3cc   :  { %p807_p3 = scmp.ne.s32.totalorder %s1005_s7, %s806_s24  ;;  %p810_p4 = scmp.lt.u32.totalorder %s806_s24, %s1005_s7 }
 0x3ce   :  { %p812_p5 = pnand %p810_p4, %p807_p3 }
 0x3d0   :  { %815 = shalt.err (!%p812_p5)
}
 0x3d1   :  { %510 = dma.vmem_to_hbm [thread:$0]  %s508_s21, 128, %s1005_s7, [#allocation4]  }
 0x3d2   :  { %822 = dma.done.wait [#allocation4], 128  }
 0x3d3   :  { %823 = vsyncadd [#allocation4], 4294967168 }
 0x3d4   :  { %514 = vsyncpa [#allocation3], 1 }
 0x3d5   :  { %515 = vsyncpa [#allocation6], 1 }
 0x3d6   :  { %516 = vsyncpa [#allocation9], 1 }
 0x3d7   :  { %517 = vsyncpa [#allocation4], 1 }

</bundles_post_ra>
